<compile_context>
chip_gen: v7x
topology: tpu7x:2x2x1
jax: 0.10.0
libtpu: 0.0.40
codegen_flags: <defaults>
</compile_context>

<pallas_src>
import functools

import jax
import jax.numpy as jnp
from jax.experimental import pallas as pl
from jax.experimental.pallas import tpu as pltpu

OUT_PAD = 128  # lane-dense padded width of the final fused output layer


def _round_up(x, m):
    return ((x + m - 1) // m) * m


def _device_kind():
    try:
        return jax.devices()[0].device_kind.lower()
    except Exception:  # pragma: no cover - defensive
        return ""


def _default_act_dtype():
    """bf16 activations on bf16-native VPU/EUP chips; f32 on older parts."""
    kind = _device_kind()
    if any(k in kind for k in ("v2", "v3", "v4", "v5")):
        return jnp.float32
    return jnp.bfloat16


def _num_tensorcores():
    """Heuristic: megacore-style parts want >=2 parallel grid steps."""
    kind = _device_kind()
    if any(k in kind for k in ("v4", "v5p", "v7")):
        return 2
    return 1


def finalnn_kernel(x_ref,
                   w1, b1, w2, b2, w3, b3, w4, b4,
                   wf1, bf1, wf2, bf2, wf3, bf3,
                   out_ref, *, act_dtype):
    def linear(h, w_ref, b_ref):
        # bf16 x bf16 on the MXU, f32 accumulation, f32 bias add.
        z = jnp.dot(h.astype(jnp.bfloat16), w_ref[...],
                    preferred_element_type=jnp.float32)
        return z + b_ref[...]

    def act(h, w_ref, b_ref):
        # tanh runs in act_dtype (bf16 on v6e/v7x -> packed VPU/EUP; f32 on v5e).
        return jnp.tanh(linear(h, w_ref, b_ref).astype(act_dtype))

    h = x_ref[...].astype(act_dtype)             # single cast at load

    # final1..final4 with tanh; dropout is identity in eval mode.
    # TODO(synk): training-mode dropout (p=0.3) would need pltpu.prng_* masking.
    h = act(h, w1, b1)
    h = act(h, w2, b2)
    h = act(h, w3, b3)
    h = act(h, w4, b4)

    # rot/trans branches fused via block-diagonal weights:
    #   [rot | trans] @ blockdiag(Wr, Wt) + [br | bt]  ==  [rot@Wr+br | trans@Wt+bt]
    h = act(h, wf1, bf1)                         # (TB, 2W)
    h = act(h, wf2, bf2)                         # (TB, 10)
    out_ref[...] = linear(h, wf3, bf3).astype(out_ref.dtype)  # (TB, OUT_PAD)


def final_nn_batched(x, fused_params, *, tile_b=1024, act_dtype=None):
    """x: (B, 2*width) float32. Returns (B, 6) float32."""
    if act_dtype is None:
        act_dtype = _default_act_dtype()

    B, two_w = x.shape
    b_pad8 = _round_up(B, 8)
    tile = min(_round_up(tile_b, 8), b_pad8)
    # Keep >= 2 parallel grid steps on 2-TensorCore parts when batch allows it,
    # so the ("parallel",) axis actually shards across cores.
    if _num_tensorcores() >= 2 and b_pad8 >= 16:
        tile = min(tile, _round_up(pl.cdiv(b_pad8, 2), 8))
    num_tiles = pl.cdiv(b_pad8, tile)
    Bp = num_tiles * tile
    if Bp != B:
        x = jnp.pad(x, ((0, Bp - B), (0, 0)))

    # Activations: tiled over the batch. Weights/biases: full-array blocks with
    # constant index_maps so they are loaded once and stay VMEM-resident.
    in_specs = [pl.BlockSpec((tile, two_w), lambda i: (i, 0))]
    in_specs += [pl.BlockSpec(p.shape, lambda i: (0, 0)) for p in fused_params]
    out_specs = pl.BlockSpec((tile, OUT_PAD), lambda i: (i, 0))

    out = pl.pallas_call(
        functools.partial(finalnn_kernel, act_dtype=act_dtype),
        out_shape=jax.ShapeDtypeStruct((Bp, OUT_PAD), jnp.bfloat16),
        grid=(num_tiles,),
        in_specs=in_specs,
        out_specs=out_specs,
        compiler_params=pltpu.CompilerParams(
            dimension_semantics=("parallel",)),  # megacore sharding
    )(x, *fused_params)
    return out[:B, :6].astype(jnp.float32)


def final_nn_forward(src_tmp, dst_tmp, fused_params):
    """Single-pair forward matching FinalNN.forward semantics. Returns (6,).

    Pure JAX: launching a Pallas kernel for one row is pure overhead (weight
    DMA + grid setup >> ~45 KFLOP of compute), so XLA handles this path.
    """
    (w1, b1, w2, b2, w3, b3, w4, b4,
     wf1, bf1, wf2, bf2, wf3, bf3) = fused_params
    h = jnp.concatenate([src_tmp, dst_tmp])[None, :].astype(jnp.float32)
    for w, b in ((w1, b1), (w2, b2), (w3, b3), (w4, b4), (wf1, bf1), (wf2, bf2)):
        h = jnp.tanh(jnp.dot(h.astype(jnp.bfloat16), w,
                             preferred_element_type=jnp.float32) + b)
    out = jnp.dot(h.astype(jnp.bfloat16), wf3,
                  preferred_element_type=jnp.float32) + bf3
    return out[0, :6]


# ----------------------------- parameter setup ------------------------------

def init_linear(key, fan_in, fan_out):
    """PyTorch-style Linear init: U(-1/sqrt(fan_in), 1/sqrt(fan_in))."""
    kw, kb = jax.random.split(key)
    bound = 1.0 / float(fan_in) ** 0.5
    w = jax.random.uniform(kw, (fan_in, fan_out), jnp.float32, -bound, bound)
    b = jax.random.uniform(kb, (1, fan_out), jnp.float32, -bound, bound)
    return w, b


def make_params(key, width):
    layer_dims = [
        (2 * width, 2 * width),  # final1
        (2 * width, 2 * width),  # final2
        (2 * width, 2 * width),  # final3
        (2 * width, 2 * width),  # final4
        (width, width),          # rot1
        (width, 5),              # rot2
        (5, 3),                  # rot3
        (width, width),          # trans1
        (width, 5),              # trans2
        (5, 3),                  # trans3
    ]
    keys = jax.random.split(key, len(layer_dims))
    params = []
    for k, (fi, fo) in zip(keys, layer_dims):
        w, b = init_linear(k, fi, fo)
        params.extend([w, b])
    return params


def block_diag(a, b):
    m1, n1 = a.shape
    m2, n2 = b.shape
    out = jnp.zeros((m1 + m2, n1 + n2), a.dtype)
    out = out.at[:m1, :n1].set(a)
    out = out.at[m1:, n1:].set(b)
    return out


def fuse_params(params):
    """Fuse rot/trans branches into block-diagonal layers; weights -> bf16."""
    (w1, b1, w2, b2, w3, b3, w4, b4,
     wr1, br1, wr2, br2, wr3, br3,
     wt1, bt1, wt2, bt2, wt3, bt3) = params

    wf1 = block_diag(wr1, wt1)                      # (2W, 2W)
    bf1 = jnp.concatenate([br1, bt1], axis=1)       # (1, 2W)
    wf2 = block_diag(wr2, wt2)                      # (2W, 10)
    bf2 = jnp.concatenate([br2, bt2], axis=1)       # (1, 10)
    wf3 = block_diag(wr3, wt3)                      # (10, 6)
    bf3 = jnp.concatenate([br3, bt3], axis=1)       # (1, 6)
    # Pad last layer to 128 output lanes for unmasked (lane-dense) stores.
    wf3 = jnp.pad(wf3, ((0, 0), (0, OUT_PAD - wf3.shape[1])))
    bf3 = jnp.pad(bf3, ((0, 0), (0, OUT_PAD - bf3.shape[1])))

    weights = [w1, w2, w3, w4, wf1, wf2, wf3]
    biases = [b1, b2, b3, b4, bf1, bf2, bf3]
    fused = []
    for w, b in zip(weights, biases):
        fused.extend([w.astype(jnp.bfloat16), b.astype(jnp.float32)])
    return fused


# ------------------------------- reference ----------------------------------

def final_nn_reference(x, params):
    """Pure-JAX batched reference (un-fused weights). x: (B, 2W) -> (B, 6)."""
    (w1, b1, w2, b2, w3, b3, w4, b4,
     wr1, br1, wr2, br2, wr3, br3,
     wt1, bt1, wt2, bt2, wt3, bt3) = params
    width = wr1.shape[0]
    h = x
    h = jnp.tanh(h @ w1 + b1)
    h = jnp.tanh(h @ w2 + b2)
    h = jnp.tanh(h @ w3 + b3)
    h = jnp.tanh(h @ w4 + b4)
    rot, trans = h[:, :width], h[:, width:]
    rot = jnp.tanh(rot @ wr1 + br1)
    rot = jnp.tanh(rot @ wr2 + br2)
    rot = rot @ wr3 + br3
    trans = jnp.tanh(trans @ wt1 + bt1)
    trans = jnp.tanh(trans @ wt2 + bt2)
    trans = trans @ wt3 + bt3
    return jnp.concatenate([rot, trans], axis=1)


if __name__ == "__main__":
    # SMALL deterministic test shapes (width=32 => 2W=64 features, batch=64).
    width = 32
    batch = 64

    root = jax.random.PRNGKey(0)
    k_params, k_src, k_dst = jax.random.split(root, 3)

    params = make_params(k_params, width)            # f32 "torch-style" params
    fused = fuse_params(params)                      # fused, bf16 weights

    src = jax.random.normal(k_src, (batch, width), jnp.float32)
    dst = jax.random.normal(k_dst, (batch, width), jnp.float32)
    x = jnp.concatenate([src, dst], axis=1)          # one slab, outside kernel

    out = final_nn_batched(x, fused)                 # (B, 6)
    out = jax.block_until_ready(out)

    # Reference uses the same bf16-rounded weight values (upcast to f32) so the
    # remaining differences are the in-kernel bf16 activation chain / bf16 out.
    ref_params = [p.astype(jnp.bfloat16).astype(jnp.float32) if i % 2 == 0 else p
                  for i, p in enumerate(params)]
    ref = final_nn_reference(x, ref_params)

    assert out.shape == (batch, 6), out.shape
    assert jnp.allclose(out, ref, atol=5e-2, rtol=5e-2), (
        float(jnp.abs(out - ref).max()))

    # Single-pair path (exactly the original module's forward signature).
    out1 = jax.block_until_ready(final_nn_forward(src[0], dst[0], fused))
    assert out1.shape == (6,), out1.shape
    assert jnp.allclose(out1, ref[0], atol=5e-2, rtol=5e-2), (out1, ref[0])

    print("KERNEL_OK")
</pallas_src>

<mosaic_0001>
module attributes {stable_mosaic.version = 11 : i64} {
  func.func @finalnn_kernel(%arg0: i32, %arg1: memref<64x64xf32, #tpu.memory_space<vmem>>, %arg2: memref<64x64xbf16, #tpu.memory_space<vmem>>, %arg3: memref<1x64xf32, #tpu.memory_space<vmem>>, %arg4: memref<64x64xbf16, #tpu.memory_space<vmem>>, %arg5: memref<1x64xf32, #tpu.memory_space<vmem>>, %arg6: memref<64x64xbf16, #tpu.memory_space<vmem>>, %arg7: memref<1x64xf32, #tpu.memory_space<vmem>>, %arg8: memref<64x64xbf16, #tpu.memory_space<vmem>>, %arg9: memref<1x64xf32, #tpu.memory_space<vmem>>, %arg10: memref<64x64xbf16, #tpu.memory_space<vmem>>, %arg11: memref<1x64xf32, #tpu.memory_space<vmem>>, %arg12: memref<64x10xbf16, #tpu.memory_space<vmem>>, %arg13: memref<1x10xf32, #tpu.memory_space<vmem>>, %arg14: memref<10x128xbf16, #tpu.memory_space<vmem>>, %arg15: memref<1x128xf32, #tpu.memory_space<vmem>>, %arg16: memref<64x128xbf16, #tpu.memory_space<vmem>>) attributes {dimension_semantics = [#tpu.dimension_semantics<parallel>], iteration_bounds = array<i64: 1>, scalar_prefetch = 0 : i64, scratch_operands = 0 : i64, tpu.core_type = #tpu.core_type<tc>, window_params = [{transform_indices = @transform_0, window_bounds = array<i64: 64, 64>}, {pipeline_mode = #tpu.pipeline_mode<synchronous>, transform_indices = @transform_1, window_bounds = array<i64: 64, 64>}, {pipeline_mode = #tpu.pipeline_mode<synchronous>, transform_indices = @transform_2, window_bounds = array<i64: 1, 64>}, {pipeline_mode = #tpu.pipeline_mode<synchronous>, transform_indices = @transform_3, window_bounds = array<i64: 64, 64>}, {pipeline_mode = #tpu.pipeline_mode<synchronous>, transform_indices = @transform_4, window_bounds = array<i64: 1, 64>}, {pipeline_mode = #tpu.pipeline_mode<synchronous>, transform_indices = @transform_5, window_bounds = array<i64: 64, 64>}, {pipeline_mode = #tpu.pipeline_mode<synchronous>, transform_indices = @transform_6, window_bounds = array<i64: 1, 64>}, {pipeline_mode = #tpu.pipeline_mode<synchronous>, transform_indices = @transform_7, window_bounds = array<i64: 64, 64>}, {pipeline_mode = #tpu.pipeline_mode<synchronous>, transform_indices = @transform_8, window_bounds = array<i64: 1, 64>}, {pipeline_mode = #tpu.pipeline_mode<synchronous>, transform_indices = @transform_9, window_bounds = array<i64: 64, 64>}, {pipeline_mode = #tpu.pipeline_mode<synchronous>, transform_indices = @transform_10, window_bounds = array<i64: 1, 64>}, {pipeline_mode = #tpu.pipeline_mode<synchronous>, transform_indices = @transform_11, window_bounds = array<i64: 64, 10>}, {pipeline_mode = #tpu.pipeline_mode<synchronous>, transform_indices = @transform_12, window_bounds = array<i64: 1, 10>}, {pipeline_mode = #tpu.pipeline_mode<synchronous>, transform_indices = @transform_13, window_bounds = array<i64: 10, 128>}, {pipeline_mode = #tpu.pipeline_mode<synchronous>, transform_indices = @transform_14, window_bounds = array<i64: 1, 128>}, {transform_indices = @transform_15, window_bounds = array<i64: 64, 128>}]} {
    %c0 = arith.constant 0 : index
    %c0_0 = arith.constant 0 : index
    %0 = vector.load %arg1[%c0, %c0_0] : memref<64x64xf32, #tpu.memory_space<vmem>>, vector<64x64xf32>
    %1 = arith.truncf %0 : vector<64x64xf32> to vector<64x64xbf16>
    %c0_1 = arith.constant 0 : index
    %c0_2 = arith.constant 0 : index
    %2 = vector.load %arg2[%c0_1, %c0_2] : memref<64x64xbf16, #tpu.memory_space<vmem>>, vector<64x64xbf16>
    %cst = arith.constant dense<0.000000e+00> : vector<64x64xf32>
    %3 = tpu.matmul %1, %2, %cst {dimension_numbers = #tpu.dot_dimension_numbers<[1], [0], [0], [1], [0, 0, 1, 1], [], []>} : vector<64x64xbf16>, vector<64x64xbf16>, vector<64x64xf32> -> vector<64x64xf32>
    %c0_3 = arith.constant 0 : index
    %c0_4 = arith.constant 0 : index
    %4 = vector.load %arg3[%c0_3, %c0_4] : memref<1x64xf32, #tpu.memory_space<vmem>>, vector<1x64xf32>
    %5 = vector.broadcast %4 : vector<1x64xf32> to vector<64x64xf32>
    %6 = arith.addf %3, %5 : vector<64x64xf32>
    %7 = arith.truncf %6 : vector<64x64xf32> to vector<64x64xbf16>
    %8 = math.tanh %7 : vector<64x64xbf16>
    %c0_5 = arith.constant 0 : index
    %c0_6 = arith.constant 0 : index
    %9 = vector.load %arg4[%c0_5, %c0_6] : memref<64x64xbf16, #tpu.memory_space<vmem>>, vector<64x64xbf16>
    %cst_7 = arith.constant dense<0.000000e+00> : vector<64x64xf32>
    %10 = tpu.matmul %8, %9, %cst_7 {dimension_numbers = #tpu.dot_dimension_numbers<[1], [0], [0], [1], [0, 0, 1, 1], [], []>} : vector<64x64xbf16>, vector<64x64xbf16>, vector<64x64xf32> -> vector<64x64xf32>
    %c0_8 = arith.constant 0 : index
    %c0_9 = arith.constant 0 : index
    %11 = vector.load %arg5[%c0_8, %c0_9] : memref<1x64xf32, #tpu.memory_space<vmem>>, vector<1x64xf32>
    %12 = vector.broadcast %11 : vector<1x64xf32> to vector<64x64xf32>
    %13 = arith.addf %10, %12 : vector<64x64xf32>
    %14 = arith.truncf %13 : vector<64x64xf32> to vector<64x64xbf16>
    %15 = math.tanh %14 : vector<64x64xbf16>
    %c0_10 = arith.constant 0 : index
    %c0_11 = arith.constant 0 : index
    %16 = vector.load %arg6[%c0_10, %c0_11] : memref<64x64xbf16, #tpu.memory_space<vmem>>, vector<64x64xbf16>
    %cst_12 = arith.constant dense<0.000000e+00> : vector<64x64xf32>
    %17 = tpu.matmul %15, %16, %cst_12 {dimension_numbers = #tpu.dot_dimension_numbers<[1], [0], [0], [1], [0, 0, 1, 1], [], []>} : vector<64x64xbf16>, vector<64x64xbf16>, vector<64x64xf32> -> vector<64x64xf32>
    %c0_13 = arith.constant 0 : index
    %c0_14 = arith.constant 0 : index
    %18 = vector.load %arg7[%c0_13, %c0_14] : memref<1x64xf32, #tpu.memory_space<vmem>>, vector<1x64xf32>
    %19 = vector.broadcast %18 : vector<1x64xf32> to vector<64x64xf32>
    %20 = arith.addf %17, %19 : vector<64x64xf32>
    %21 = arith.truncf %20 : vector<64x64xf32> to vector<64x64xbf16>
    %22 = math.tanh %21 : vector<64x64xbf16>
    %c0_15 = arith.constant 0 : index
    %c0_16 = arith.constant 0 : index
    %23 = vector.load %arg8[%c0_15, %c0_16] : memref<64x64xbf16, #tpu.memory_space<vmem>>, vector<64x64xbf16>
    %cst_17 = arith.constant dense<0.000000e+00> : vector<64x64xf32>
    %24 = tpu.matmul %22, %23, %cst_17 {dimension_numbers = #tpu.dot_dimension_numbers<[1], [0], [0], [1], [0, 0, 1, 1], [], []>} : vector<64x64xbf16>, vector<64x64xbf16>, vector<64x64xf32> -> vector<64x64xf32>
    %c0_18 = arith.constant 0 : index
    %c0_19 = arith.constant 0 : index
    %25 = vector.load %arg9[%c0_18, %c0_19] : memref<1x64xf32, #tpu.memory_space<vmem>>, vector<1x64xf32>
    %26 = vector.broadcast %25 : vector<1x64xf32> to vector<64x64xf32>
    %27 = arith.addf %24, %26 : vector<64x64xf32>
    %28 = arith.truncf %27 : vector<64x64xf32> to vector<64x64xbf16>
    %29 = math.tanh %28 : vector<64x64xbf16>
    %c0_20 = arith.constant 0 : index
    %c0_21 = arith.constant 0 : index
    %30 = vector.load %arg10[%c0_20, %c0_21] : memref<64x64xbf16, #tpu.memory_space<vmem>>, vector<64x64xbf16>
    %cst_22 = arith.constant dense<0.000000e+00> : vector<64x64xf32>
    %31 = tpu.matmul %29, %30, %cst_22 {dimension_numbers = #tpu.dot_dimension_numbers<[1], [0], [0], [1], [0, 0, 1, 1], [], []>} : vector<64x64xbf16>, vector<64x64xbf16>, vector<64x64xf32> -> vector<64x64xf32>
    %c0_23 = arith.constant 0 : index
    %c0_24 = arith.constant 0 : index
    %32 = vector.load %arg11[%c0_23, %c0_24] : memref<1x64xf32, #tpu.memory_space<vmem>>, vector<1x64xf32>
    %33 = vector.broadcast %32 : vector<1x64xf32> to vector<64x64xf32>
    %34 = arith.addf %31, %33 : vector<64x64xf32>
    %35 = arith.truncf %34 : vector<64x64xf32> to vector<64x64xbf16>
    %36 = math.tanh %35 : vector<64x64xbf16>
    %c0_25 = arith.constant 0 : index
    %c0_26 = arith.constant 0 : index
    %37 = vector.load %arg12[%c0_25, %c0_26] : memref<64x10xbf16, #tpu.memory_space<vmem>>, vector<64x10xbf16>
    %cst_27 = arith.constant dense<0.000000e+00> : vector<64x10xf32>
    %38 = tpu.matmul %36, %37, %cst_27 {dimension_numbers = #tpu.dot_dimension_numbers<[1], [0], [0], [1], [0, 0, 1, 1], [], []>} : vector<64x64xbf16>, vector<64x10xbf16>, vector<64x10xf32> -> vector<64x10xf32>
    %c0_28 = arith.constant 0 : index
    %c0_29 = arith.constant 0 : index
    %39 = vector.load %arg13[%c0_28, %c0_29] : memref<1x10xf32, #tpu.memory_space<vmem>>, vector<1x10xf32>
    %40 = vector.broadcast %39 : vector<1x10xf32> to vector<64x10xf32>
    %41 = arith.addf %38, %40 : vector<64x10xf32>
    %42 = arith.truncf %41 : vector<64x10xf32> to vector<64x10xbf16>
    %43 = math.tanh %42 : vector<64x10xbf16>
    %c0_30 = arith.constant 0 : index
    %c0_31 = arith.constant 0 : index
    %44 = vector.load %arg14[%c0_30, %c0_31] : memref<10x128xbf16, #tpu.memory_space<vmem>>, vector<10x128xbf16>
    %cst_32 = arith.constant dense<0.000000e+00> : vector<64x128xf32>
    %45 = tpu.matmul %43, %44, %cst_32 {dimension_numbers = #tpu.dot_dimension_numbers<[1], [0], [0], [1], [0, 0, 1, 1], [], []>} : vector<64x10xbf16>, vector<10x128xbf16>, vector<64x128xf32> -> vector<64x128xf32>
    %c0_33 = arith.constant 0 : index
    %c0_34 = arith.constant 0 : index
    %46 = vector.load %arg15[%c0_33, %c0_34] : memref<1x128xf32, #tpu.memory_space<vmem>>, vector<1x128xf32>
    %47 = vector.broadcast %46 : vector<1x128xf32> to vector<64x128xf32>
    %48 = arith.addf %45, %47 : vector<64x128xf32>
    %49 = arith.truncf %48 : vector<64x128xf32> to vector<64x128xbf16>
    %c0_35 = arith.constant 0 : index
    %c0_36 = arith.constant 0 : index
    %50 = vector.load %arg16[%c0_35, %c0_36] : memref<64x128xbf16, #tpu.memory_space<vmem>>, vector<64x128xbf16>
    tpu.vector_store %arg16[%c0_35, %c0_36], %49 {strides = array<i32>} : memref<64x128xbf16, #tpu.memory_space<vmem>>, vector<64x128xbf16>,
    return
  }
  func.func @transform_0(%arg0: i32) -> (i32, i32) {
    %c0_i32 = arith.constant 0 : i32
    %c0_i32_0 = arith.constant 0 : i32
    return %arg0, %c0_i32 : i32, i32
  }
  func.func @transform_1(%arg0: i32) -> (i32, i32) {
    %c0_i32 = arith.constant 0 : i32
    %c0_i32_0 = arith.constant 0 : i32
    %c0_i32_1 = arith.constant 0 : i32
    return %c0_i32, %c0_i32_0 : i32, i32
  }
  func.func @transform_2(%arg0: i32) -> (i32, i32) {
    %c0_i32 = arith.constant 0 : i32
    %c0_i32_0 = arith.constant 0 : i32
    %c0_i32_1 = arith.constant 0 : i32
    return %c0_i32, %c0_i32_0 : i32, i32
  }
  func.func @transform_3(%arg0: i32) -> (i32, i32) {
    %c0_i32 = arith.constant 0 : i32
    %c0_i32_0 = arith.constant 0 : i32
    %c0_i32_1 = arith.constant 0 : i32
    return %c0_i32, %c0_i32_0 : i32, i32
  }
  func.func @transform_4(%arg0: i32) -> (i32, i32) {
    %c0_i32 = arith.constant 0 : i32
    %c0_i32_0 = arith.constant 0 : i32
    %c0_i32_1 = arith.constant 0 : i32
    return %c0_i32, %c0_i32_0 : i32, i32
  }
  func.func @transform_5(%arg0: i32) -> (i32, i32) {
    %c0_i32 = arith.constant 0 : i32
    %c0_i32_0 = arith.constant 0 : i32
    %c0_i32_1 = arith.constant 0 : i32
    return %c0_i32, %c0_i32_0 : i32, i32
  }
  func.func @transform_6(%arg0: i32) -> (i32, i32) {
    %c0_i32 = arith.constant 0 : i32
    %c0_i32_0 = arith.constant 0 : i32
    %c0_i32_1 = arith.constant 0 : i32
    return %c0_i32, %c0_i32_0 : i32, i32
  }
  func.func @transform_7(%arg0: i32) -> (i32, i32) {
    %c0_i32 = arith.constant 0 : i32
    %c0_i32_0 = arith.constant 0 : i32
    %c0_i32_1 = arith.constant 0 : i32
    return %c0_i32, %c0_i32_0 : i32, i32
  }
  func.func @transform_8(%arg0: i32) -> (i32, i32) {
    %c0_i32 = arith.constant 0 : i32
    %c0_i32_0 = arith.constant 0 : i32
    %c0_i32_1 = arith.constant 0 : i32
    return %c0_i32, %c0_i32_0 : i32, i32
  }
  func.func @transform_9(%arg0: i32) -> (i32, i32) {
    %c0_i32 = arith.constant 0 : i32
    %c0_i32_0 = arith.constant 0 : i32
    %c0_i32_1 = arith.constant 0 : i32
    return %c0_i32, %c0_i32_0 : i32, i32
  }
  func.func @transform_10(%arg0: i32) -> (i32, i32) {
    %c0_i32 = arith.constant 0 : i32
    %c0_i32_0 = arith.constant 0 : i32
    %c0_i32_1 = arith.constant 0 : i32
    return %c0_i32, %c0_i32_0 : i32, i32
  }
  func.func @transform_11(%arg0: i32) -> (i32, i32) {
    %c0_i32 = arith.constant 0 : i32
    %c0_i32_0 = arith.constant 0 : i32
    %c0_i32_1 = arith.constant 0 : i32
    return %c0_i32, %c0_i32_0 : i32, i32
  }
  func.func @transform_12(%arg0: i32) -> (i32, i32) {
    %c0_i32 = arith.constant 0 : i32
    %c0_i32_0 = arith.constant 0 : i32
    %c0_i32_1 = arith.constant 0 : i32
    return %c0_i32, %c0_i32_0 : i32, i32
  }
  func.func @transform_13(%arg0: i32) -> (i32, i32) {
    %c0_i32 = arith.constant 0 : i32
    %c0_i32_0 = arith.constant 0 : i32
    %c0_i32_1 = arith.constant 0 : i32
    return %c0_i32, %c0_i32_0 : i32, i32
  }
  func.func @transform_14(%arg0: i32) -> (i32, i32) {
    %c0_i32 = arith.constant 0 : i32
    %c0_i32_0 = arith.constant 0 : i32
    %c0_i32_1 = arith.constant 0 : i32
    return %c0_i32, %c0_i32_0 : i32, i32
  }
  func.func @transform_15(%arg0: i32) -> (i32, i32) {
    %c0_i32 = arith.constant 0 : i32
    %c0_i32_0 = arith.constant 0 : i32
    return %arg0, %c0_i32 : i32, i32
  }
}

</mosaic_0001>

<bundles_post_ra>
// kernel: tpu_custom_call.1
= control target key start
LH: loop header
LB: loop body
LE: loop exit
PB: predicated region body
PF: predicated region fallthrough
CT: control target
= control target key end

     0   :  { %s1910_s0 = inlined_call_operand.hbm [shape: f32[64,64], index: 0, kind: input, shape index: {}]   ;;  %s1911_s1 = inlined_call_operand.vmem [shape: bf16[64,64], index: 1, kind: input, shape index: {}]   ;;  %s1912_s2 = inlined_call_operand.vmem [shape: f32[1,64], index: 2, kind: input, shape index: {}]   ;;  %s1913_s3 = inlined_call_operand.hbm [shape: bf16[64,64], index: 3, kind: input, shape index: {}]   ;;  %s1914_s4 = inlined_call_operand.hbm [shape: f32[1,64], index: 4, kind: input, shape index: {}]   ;;  %s1915_s5 = inlined_call_operand.hbm [shape: bf16[64,64], index: 5, kind: input, shape index: {}]   ;;  %s1916_s6 = inlined_call_operand.hbm [shape: f32[1,64], index: 6, kind: input, shape index: {}]   ;;  %s1917_s7 = inlined_call_operand.vmem [shape: bf16[64,64], index: 7, kind: input, shape index: {}]   ;;  %s1918_s8 = inlined_call_operand.hbm [shape: f32[1,64], index: 8, kind: input, shape index: {}]   ;;  %s1919_s9 = inlined_call_operand.hbm [shape: bf16[64,64], index: 9, kind: input, shape index: {}]   ;;  %s1920_s10 = inlined_call_operand.hbm [shape: f32[1,64], index: 10, kind: input, shape index: {}]   ;;  %s1921_s11 = inlined_call_operand.vmem [shape: bf16[64,10], index: 11, kind: input, shape index: {}]   ;;  %s1922_s12 = inlined_call_operand.vmem [shape: f32[1,10], index: 12, kind: input, shape index: {}]   ;;  %s1923_s13 = inlined_call_operand.vmem [shape: bf16[10,128], index: 13, kind: input, shape index: {}]   ;;  %s1924_s14 = inlined_call_operand.vmem [shape: f32[1,128], index: 14, kind: input, shape index: {}]   ;;  %s1925_s15 = inlined_call_operand.hbm [shape: bf16[64,128], index: 15, kind: output, shape index: {}]  }
   0x1   :  { %1927 = sst [smem:[#allocation23_spill]] %s1925_s15 }
   0x2   :  { %20 = vsyncpa [#allocation3], 0 }
   0x3   :  { %21 = vsyncpa [#allocation6], 0 }
   0x4   :  { %22 = vsyncpa [#allocation9], 0 }
   0x5   :  { %23 = vsyncpa [#allocation12], 0 }
   0x6   :  { %24 = vsyncpa [#allocation15], 0 }
   0x7   :  { %25 = vsyncpa [#allocation4], 0  ;;  %s1625_s18 = smov [#allocation5]   ;;  %s1415_s22 = scalar_lea.hbm %s1913_s3, 512 }
   0x8   :  { %s47_s19 = sshll.u32 %s1625_s18, 4  ;;  %p1416_p0 = scmp.ne.s32.totalorder %s1913_s3, %s1415_s22  ;;  %s48_s19 = int_to_ptr.vmem [resolvable:$true] %s47_s19 }
   0x9   :  { %p1419_p1 = scmp.lt.u32.totalorder %s1415_s22, %s1913_s3 }
   0xb   :  { %p1421_p2 = pnand %p1419_p1, %p1416_p0 }
   0xd   :  { %1424 = shalt.err (!%p1421_p2)
}
   0xe   :  { %s1425_s27 = scalar_lea.vmem %s48_s19, 512  ;;  %p1430_p4 = scmp.lt.s32.totalorder %s48_s19, %s48_s19 }
   0xf   :  { %p1426_p3 = scmp.ne.s32.totalorder %s48_s19, %s1425_s27  ;;  %p1431_p5 = scmp.lt.s32.totalorder %s1425_s27, %s1425_s27 }
  0x11   :  { %p1432_p6 = por %p1431_p5, %p1430_p4 }
  0x13   :  { %p1433_p7 = pnand %p1432_p6, %p1426_p3 }
  0x15   :  { %1436 = shalt.err (!%p1433_p7)
}
  0x16   :  { %s1626_s28 = smov 64   ;;  %s1627_s29 = smov 4  }
  0x17   :  { %53 = dma.hbm_to_vmem [thread:$0]  %s1913_s3, 512, %s48_s19, [#allocation6], %s1626_s28, %s1626_s28, %s1627_s29  }
  0x18   :  { %s1628_s17 = smov [#allocation8]   ;;  %s1629_s20 = smov [#allocation11]  }
  0x19   :  { %s69_s18 = sshll.u32 %s1628_s17, 4  ;;  %s94_s21 = sshll.u32 %s1629_s20, 4  ;;  %s70_s18 = int_to_ptr.vmem [resolvable:$true] %s69_s18  ;;  %s95_s21 = int_to_ptr.vmem [resolvable:$true] %s94_s21 }
  0x1a   :  { %s1437_s24 = scalar_lea.hbm %s1915_s5, 512 }
  0x1b   :  { %p1438_p8 = scmp.ne.s32.totalorder %s1915_s5, %s1437_s24  ;;  %p1441_p9 = scmp.lt.u32.totalorder %s1437_s24, %s1915_s5 }
  0x1d   :  { %p1443_p10 = pnand %p1441_p9, %p1438_p8 }
  0x1f   :  { %1446 = shalt.err (!%p1443_p10)
}
  0x20   :  { %s1447_s3 = scalar_lea.vmem %s70_s18, 512  ;;  %p1452_p12 = scmp.lt.s32.totalorder %s70_s18, %s70_s18 }
  0x21   :  { %p1448_p11 = scmp.ne.s32.totalorder %s70_s18, %s1447_s3  ;;  %p1453_p13 = scmp.lt.s32.totalorder %s1447_s3, %s1447_s3 }
  0x23   :  { %p1454_p0 = por %p1453_p13, %p1452_p12 }
  0x25   :  { %p1455_p1 = pnand %p1454_p0, %p1448_p11 }
  0x27   :  { %1458 = shalt.err (!%p1455_p1)
}
  0x28   :  { %75 = dma.hbm_to_vmem [thread:$0]  %s1915_s5, 512, %s70_s18, [#allocation9], %s1626_s28, %s1626_s28, %s1627_s29  }
  0x29   :  { %s1459_s17 = scalar_lea.hbm %s1918_s8, 16 }
  0x2a   :  { %p1460_p2 = scmp.ne.s32.totalorder %s1918_s8, %s1459_s17  ;;  %p1463_p3 = scmp.lt.u32.totalorder %s1459_s17, %s1918_s8 }
  0x2c   :  { %p1465_p4 = pnand %p1463_p3, %p1460_p2 }
  0x2e   :  { %1468 = shalt.err (!%p1465_p4)
}
  0x2f   :  { %s1469_s25 = scalar_lea.vmem %s95_s21, 16  ;;  %s1473_s26 = scalar_lea.vmem %s95_s21, 32 }
  0x30   :  { %p1470_p5 = scmp.ne.s32.totalorder %s95_s21, %s1469_s25  ;;  %p1474_p6 = scmp.lt.s32.totalorder %s95_s21, %s95_s21 }
  0x31   :  { %p1475_p7 = scmp.lt.s32.totalorder %s1473_s26, %s1469_s25 }
  0x33   :  { %p1476_p8 = por %p1475_p7, %p1474_p6 }
  0x35   :  { %p1477_p9 = pnand %p1476_p8, %p1470_p5 }
  0x37   :  { %1480 = shalt.err (!%p1477_p9)
}
  0x38   :  { %97 = dma.hbm_to_vmem [thread:$0]  %s1918_s8, 16, %s95_s21, [#allocation12]  }
  0x39   :  { %s1630_s27 = smov [#allocation2]   ;;  %s1481_s16 = scalar_lea.hbm %s1910_s0, 1024 }
  0x3a   :  { %s31_s3 = sshll.u32 %s1630_s27, 4  ;;  %p1482_p10 = scmp.ne.s32.totalorder %s1910_s0, %s1481_s16  ;;  %s32_s3 = int_to_ptr.vmem [resolvable:$true] %s31_s3 }
  0x3b   :  { %p1485_p11 = scmp.lt.u32.totalorder %s1481_s16, %s1910_s0 }
  0x3d   :  { %p1487_p12 = pnand %p1485_p11, %p1482_p10 }
  0x3f   :  { %1490 = shalt.err (!%p1487_p12)
}
  0x40   :  { %s1491_s23 = scalar_lea.vmem %s32_s3, 1024  ;;  %p1496_p0 = scmp.lt.s32.totalorder %s32_s3, %s32_s3 }
  0x41   :  { %p1492_p13 = scmp.ne.s32.totalorder %s32_s3, %s1491_s23  ;;  %p1497_p1 = scmp.lt.s32.totalorder %s1491_s23, %s1491_s23 }
  0x43   :  { %p1498_p2 = por %p1497_p1, %p1496_p0 }
  0x45   :  { %p1499_p3 = pnand %p1498_p2, %p1492_p13 }
  0x47   :  { %1502 = shalt.err (!%p1499_p3)
}
  0x48   :  { %s1631_s8 = smov 128   ;;  %s1632_s21 = smov 8  }
  0x49   :  { %37 = dma.hbm_to_vmem [thread:$0]  %s1910_s0, 1024, %s32_s3, [#allocation3], %s1631_s8, %s1631_s8, %s1632_s21  }
  0x4a   :  { %s1633_s26 = smov [#allocation7]   ;;  %s1634_s18 = smov [#allocation10]  }
  0x4b   :  { %s60_s5 = sshll.u32 %s1633_s26, 4  ;;  %s82_s27 = sshll.u32 %s1634_s18, 4  ;;  %s61_s5 = int_to_ptr.vmem [resolvable:$true] %s60_s5  ;;  %s83_s27 = int_to_ptr.vmem [resolvable:$true] %s82_s27 }
  0x4c   :  { %s1503_s16 = scalar_lea.hbm %s1914_s4, 16 }
  0x4d   :  { %p1504_p4 = scmp.ne.s32.totalorder %s1914_s4, %s1503_s16  ;;  %p1507_p5 = scmp.lt.u32.totalorder %s1503_s16, %s1914_s4 }
  0x4f   :  { %p1509_p6 = pnand %p1507_p5, %p1504_p4 }
  0x51   :  { %1512 = shalt.err (!%p1509_p6)
}
  0x52   :  { %s1513_s0 = scalar_lea.vmem %s61_s5, 16  ;;  %s1517_s3 = scalar_lea.vmem %s61_s5, 32 }
  0x53   :  { %p1514_p7 = scmp.ne.s32.totalorder %s61_s5, %s1513_s0  ;;  %p1518_p8 = scmp.lt.s32.totalorder %s61_s5, %s61_s5 }
  0x54   :  { %p1519_p9 = scmp.lt.s32.totalorder %s1517_s3, %s1513_s0 }
  0x56   :  { %p1520_p10 = por %p1519_p9, %p1518_p8 }
  0x58   :  { %p1521_p11 = pnand %p1520_p10, %p1514_p7 }
  0x5a   :  { %1524 = shalt.err (!%p1521_p11)
}
  0x5b   :  { %63 = dma.hbm_to_vmem [thread:$0]  %s1914_s4, 16, %s61_s5, [#allocation6]  }
  0x5c   :  { %s1525_s25 = scalar_lea.hbm %s1916_s6, 16 }
  0x5d   :  { %p1526_p12 = scmp.ne.s32.totalorder %s1916_s6, %s1525_s25  ;;  %p1529_p13 = scmp.lt.u32.totalorder %s1525_s25, %s1916_s6 }
  0x5f   :  { %p1531_p0 = pnand %p1529_p13, %p1526_p12 }
  0x61   :  { %1534 = shalt.err (!%p1531_p0)
}
  0x62   :  { %s1535_s16 = scalar_lea.vmem %s83_s27, 16  ;;  %s1539_s15 = scalar_lea.vmem %s83_s27, 32 }
  0x63   :  { %p1536_p1 = scmp.ne.s32.totalorder %s83_s27, %s1535_s16  ;;  %p1540_p2 = scmp.lt.s32.totalorder %s83_s27, %s83_s27 }
  0x64   :  { %p1541_p3 = scmp.lt.s32.totalorder %s1539_s15, %s1535_s16 }
  0x66   :  { %p1542_p4 = por %p1541_p3, %p1540_p2 }
  0x68   :  { %p1543_p5 = pnand %p1542_p4, %p1536_p1 }
  0x6a   :  { %1546 = shalt.err (!%p1543_p5)
}
  0x6b   :  { %85 = dma.hbm_to_vmem [thread:$0]  %s1916_s6, 16, %s83_s27, [#allocation9]  }
  0x6c   :  { %s1635_s17 = smov [#allocation13]   ;;  %s1636_s22 = smov [#allocation14]  }
  0x6d   :  { %s103_s20 = sshll.u32 %s1635_s17, 4  ;;  %s116_s0 = sshll.u32 %s1636_s22, 4  ;;  %s104_s20 = int_to_ptr.vmem [resolvable:$true] %s103_s20  ;;  %s117_s0 = int_to_ptr.vmem [resolvable:$true] %s116_s0 }
  0x6e   :  { %s1547_s8 = scalar_lea.hbm %s1919_s9, 512 }
  0x6f   :  { %p1548_p6 = scmp.ne.s32.totalorder %s1919_s9, %s1547_s8  ;;  %p1551_p7 = scmp.lt.u32.totalorder %s1547_s8, %s1919_s9 }
  0x71   :  { %p1553_p8 = pnand %p1551_p7, %p1548_p6 }
  0x73   :  { %1556 = shalt.err (!%p1553_p8)
}
  0x74   :  { %s1557_s6 = scalar_lea.vmem %s104_s20, 512  ;;  %p1562_p10 = scmp.lt.s32.totalorder %s104_s20, %s104_s20 }
  0x75   :  { %p1558_p9 = scmp.ne.s32.totalorder %s104_s20, %s1557_s6  ;;  %p1563_p11 = scmp.lt.s32.totalorder %s1557_s6, %s1557_s6 }
  0x77   :  { %p1564_p12 = por %p1563_p11, %p1562_p10 }
  0x79   :  { %p1565_p13 = pnand %p1564_p12, %p1558_p9 }
  0x7b   :  { %1568 = shalt.err (!%p1565_p13)
}
  0x7c   :  { %109 = dma.hbm_to_vmem [thread:$0]  %s1919_s9, 512, %s104_s20, [#allocation12], %s1626_s28, %s1626_s28, %s1627_s29  }
  0x7d   :  { %s1569_s16 = scalar_lea.hbm %s1920_s10, 16 }
  0x7e   :  { %p1570_p0 = scmp.ne.s32.totalorder %s1920_s10, %s1569_s16  ;;  %p1573_p1 = scmp.lt.u32.totalorder %s1569_s16, %s1920_s10 }
  0x80   :  { %p1575_p2 = pnand %p1573_p1, %p1570_p0 }
  0x82   :  { %1578 = shalt.err (!%p1575_p2)
}
  0x83   :  { %s1579_s22 = scalar_lea.vmem %s117_s0, 16  ;;  %s1583_s3 = scalar_lea.vmem %s117_s0, 32 }
  0x84   :  { %p1580_p3 = scmp.ne.s32.totalorder %s117_s0, %s1579_s22  ;;  %p1584_p4 = scmp.lt.s32.totalorder %s117_s0, %s117_s0 }
  0x85   :  { %p1585_p5 = scmp.lt.s32.totalorder %s1583_s3, %s1579_s22 }
  0x87   :  { %p1586_p6 = por %p1585_p5, %p1584_p4 }
  0x89   :  { %p1587_p7 = pnand %p1586_p6, %p1580_p3 }
  0x8b   :  { %1590 = shalt.err (!%p1587_p7)
}
  0x8c   :  { %119 = dma.hbm_to_vmem [thread:$0]  %s1920_s10, 16, %s117_s0, [#allocation15]  }
  0x8d   :  { %1613 = dma.done.wait [#allocation3], 1024  }
  0x8e   :  { %1614 = vsyncadd [#allocation3], 4294966272 }
  0x8f   :  { %1615 = dma.done.wait [#allocation6], 528  }
  0x90   :  { %1616 = vsyncadd [#allocation6], 4294966768 }
  0x91   :  { %1617 = dma.done.wait [#allocation9], 528  }
  0x92   :  { %1618 = vsyncadd [#allocation9], 4294966768 }
  0x93   :  { %1619 = dma.done.wait [#allocation12], 528  }
  0x94   :  { %1620 = vsyncadd [#allocation12], 4294966768 }
  0x95   :  { %1621 = dma.done.wait [#allocation15], 16  }
  0x96   :  { %1622 = vsyncadd [#allocation15], 4294967280  ;;  %v1342_v0 = vld [vmem:[%s1911_s1] sm:$0xff]   ;;  %v1343_v1 = vld [vmem:[%s1911_s1 + $0x8] sm:$0xff]   ;;  %vm204_vm0 = vcmask 523264   ;;  %vm937_vm1 = vcmask 1044480  }
  0x97   :  { %1219 = vmatprep.subr.bf16.mxu0 %v1342_v0  ;;  %v1344_v2 = vld [vmem:[%s1911_s1 + $0x10] sm:$0xff]   ;;  %v153_v3 = vld [vmem:[#allocation2] sm:$0xff]  ;;  %v154_v4 = vld [vmem:[#allocation2 + $0x8] sm:$0xff]  ;;  %vm924_vm2 = vcmask 80896   ;;  %s1637_s10 = smov [#allocation16]  }
  0x98   :  { %1220 = vmatpush3.bf16.msra.mxu0 %v1342_v0  ;;  %v161_v5 = vpack.c.bf16 %v154_v4, %v153_v3  ;;  %v1345_v6 = vld [vmem:[%s1911_s1 + $0x18] sm:$0xff]   ;;  %v155_v7 = vld [vmem:[#allocation2 + $0x10] sm:$0xff]  ;;  %v157_v9 = vld [vmem:[#allocation2 + $0x20] sm:$0xff]  ;;  %s1051_s0 = sshll.u32 %s1637_s10, 4  ;;  %s1052_s0 = int_to_ptr.vmem [resolvable:$true] %s1051_s0 }
  0x99   :  { %1221 = vmatprep.subr.bf16.mxu0 %v1343_v1  ;;  %v156_v8 = vld [vmem:[#allocation2 + $0x18] sm:$0xff]  ;;  %v158_v10 = vld [vmem:[#allocation2 + $0x28] sm:$0xff]  ;;  %v159_v13 = vld [vmem:[#allocation2 + $0x30] sm:$0xff]  ;;  %p1596_p9 = scmp.lt.s32.totalorder %s1052_s0, %s1052_s0 }
  0x9a   :  { %1227 = vmatprep.mubr.msk.bf16.mxu0 %vm204_vm0, %v161_v5  ;;  %v162_v11 = vpack.c.bf16 %v156_v8, %v155_v7  ;;  %v163_v12 = vpack.c.bf16 %v158_v10, %v157_v9  ;;  %v160_v14 = vld [vmem:[#allocation2 + $0x38] sm:$0xff]  ;;  %v1346_v16 = vld [vmem:[#allocation5] sm:$0xff]   ;;  %v1347_v17 = vld [vmem:[#allocation5 + $0x8] sm:$0xff]  }
  0x9b   :  { %v164_v15 = vpack.c.bf16 %v160_v14, %v159_v13  ;;  %1235 = vmatprep.subr.bf16.mxu1 %v1346_v16  ;;  %v1348_v18 = vld [vmem:[#allocation5 + $0x10] sm:$0xff]   ;;  %v1349_v19 = vld [vmem:[#allocation5 + $0x18] sm:$0xff]   ;;  %v1067_v21 = vld [vmem:[%s1912_s2] ss:$0 sm:$0xff] }
  0x9c   :  { %1222 = vmatpush3.bf16.msra.mxu0 %v1343_v1  ;;  %1236 = vmatpush3.bf16.msra.mxu1 %v1346_v16  ;;  %v1350_v45 = vld [vmem:[#allocation8] sm:$0xff]   ;;  %v1351_v46 = vld [vmem:[#allocation8 + $0x8] sm:$0xff]   ;;  %v1352_v47 = vld [vmem:[#allocation8 + $0x10] sm:$0xff]  }
  0x9d   :  { %1223 = vmatprep.subr.bf16.mxu0 %v1344_v2  ;;  %1237 = vmatprep.subr.bf16.mxu1 %v1347_v17  ;;  %v1353_v48 = vld [vmem:[#allocation8 + $0x18] sm:$0xff]  }
  0x9e   :  { %v1076_v50 = vld [vmem:[#allocation7] ss:$0 sm:$0xff]  ;;  %v1357_v13 = vld [vmem:[%s1917_s7 + $0x18] sm:$0xff]  }
  0x9f   :  { %v1354_v10 = vld [vmem:[%s1917_s7] sm:$0xff]  }
  0xa0   :  { %1224 = vmatpush3.bf16.msra.mxu0 %v1344_v2  ;;  %1238 = vmatpush3.bf16.msra.mxu1 %v1347_v17 }
  0xa1   :  { %1225 = vmatprep.subr.bf16.mxu0 %v1345_v6  ;;  %1239 = vmatprep.subr.bf16.mxu1 %v1348_v18 }
  0xa4   :  { %1226 = vmatpush3.bf16.msra.mxu0 %v1345_v6  ;;  %1240 = vmatpush3.bf16.msra.mxu1 %v1348_v18 }
  0xa5   :  { %1241 = vmatprep.subr.bf16.mxu1 %v1349_v19  ;;  %1251 = vmatprep.subr.bf16.mxu0 %v1350_v45 }
  0xa7   :  { %1228 = vmatmul.mubr.msk.bf16.vlgmr.msra.gmra.mrb[0].mxu0 %vm204_vm0, %v162_v11  ;;  %v1355_v11 = vld [vmem:[%s1917_s7 + $0x8] sm:$0xff]  }
  0xa8   :  { %1231 = vmatprep.mubr.msk.bf16.mxu0 %vm204_vm0, %v163_v12  ;;  %1242 = vmatpush3.bf16.msra.mxu1 %v1349_v19  ;;  %v1356_v12 = vld [vmem:[%s1917_s7 + $0x10] sm:$0xff]  }
  0xa9   :  { %1252 = vmatpush3.bf16.msra.mxu0 %v1350_v45  ;;  %1267 = vmatprep.subr.bf16.mxu1 %v1354_v10 }
  0xaa   :  { %1253 = vmatprep.subr.bf16.mxu0 %v1351_v46 }
  0xad   :  { %1254 = vmatpush3.bf16.msra.mxu0 %v1351_v46 }
  0xae   :  { %1255 = vmatprep.subr.bf16.mxu0 %v1352_v47 }
  0xaf   :  { %1232 = vmatmul.mubr.msk.bf16.gmra.mrb[4].mxu0 %vm204_vm0, %v164_v15  ;;  %v1085_v15 = vld [vmem:[#allocation10] ss:$0 sm:$0xff] }
  0xb1   :  { %1256 = vmatpush3.bf16.msra.mxu0 %v1352_v47 }
  0xb2   :  { %1257 = vmatprep.subr.bf16.mxu0 %v1353_v48 }
  0xb5   :  { %1258 = vmatpush3.bf16.msra.mxu0 %v1353_v48 }
 0x17a   :  { %v1229_v20 = vpop.f32.mrb[0].mxu0 }
 0x17b   :  { %v251_v22 = vpop.f32.mrb[1].mxu0  ;;  %v260_v24 = vadd.f32 %v1229_v20, %v1067_v21 }
 0x17c   :  { %v1230_v23 = vpop.f32.mrb[2].mxu0  ;;  %v252_v27 = vadd.f32 %v1067_v21, %v251_v22 }
 0x17d   :  { %v263_v25 = vadd.f32 %v1230_v23, %v1067_v21  ;;  %v254_v26 = vpop.f32.mrb[3].mxu0 }
 0x17e   :  { %v255_v28 = vadd.f32 %v1067_v21, %v254_v26 }
 0x17f   :  { %v283_v29 = vpack.c.bf16 %v263_v25, %v260_v24 }
 0x180   :  { %v282_v30 = vpack.c.bf16 %v255_v28, %v252_v27 }
 0x182   :  { %1367 = vtanh.bf16 %v282_v30  ;;  %v1233_v31 = vpop.f32.mrb[4].mxu0 }
 0x183   :  { %1369 = vtanh.bf16 %v283_v29  ;;  %v267_v32 = vpop.f32.mrb[5].mxu0  ;;  %v276_v34 = vadd.f32 %v1233_v31, %v1067_v21 }
 0x184   :  { %v1234_v33 = vpop.f32.mrb[6].mxu0  ;;  %v268_v37 = vadd.f32 %v1067_v21, %v267_v32 }
 0x185   :  { %v279_v35 = vadd.f32 %v1234_v33, %v1067_v21  ;;  %v270_v36 = vpop.f32.mrb[7].mxu0 }
 0x186   :  { %v271_v38 = vadd.f32 %v1067_v21, %v270_v36 }
 0x187   :  { %v285_v39 = vpack.c.bf16 %v279_v35, %v276_v34 }
 0x188   :  { %v284_v40 = vpack.c.bf16 %v271_v38, %v268_v37 }
 0x18a   :  { %1371 = vtanh.bf16 %v284_v40  ;;  %v1359_v40 = vld [vmem:[#allocation13 + $0x8] sm:$0xff]  }
 0x18b   :  { %1373 = vtanh.bf16 %v285_v39  ;;  %v1358_v39 = vld [vmem:[#allocation13] sm:$0xff]  }
 0x18c   :  { %1283 = vmatprep.subr.bf16.mxu0 %v1358_v39 }
 0x18d   :  { %v1368_v41 = vpop.eup %1367 }
 0x18e   :  { %v1370_v42 = vpop.eup %1369  ;;  %1243 = vmatprep.mubr.msk.bf16.mxu1 %vm204_vm0, %v1368_v41  ;;  %v1360_v41 = vld [vmem:[#allocation13 + $0x10] sm:$0xff]  }
 0x18f   :  { %1244 = vmatmul.mubr.msk.bf16.vlgmr.msra.gmra.mrb[0].mxu1 %vm204_vm0, %v1370_v42  ;;  %v1361_v42 = vld [vmem:[#allocation13 + $0x18] sm:$0xff]  }
 0x190   :  { %1268 = vmatpush3.bf16.msra.mxu1 %v1354_v10 }
 0x191   :  { %1269 = vmatprep.subr.bf16.mxu1 %v1355_v11 }
 0x194   :  { %1270 = vmatpush3.bf16.msra.mxu1 %v1355_v11 }
 0x195   :  { %v1372_v43 = vpop.eup %1371  ;;  %1271 = vmatprep.subr.bf16.mxu1 %v1356_v12 }
 0x196   :  { %v1374_v44 = vpop.eup %1373  ;;  %1247 = vmatprep.mubr.msk.bf16.mxu1 %vm204_vm0, %v1372_v43 }
 0x197   :  { %1248 = vmatmul.mubr.msk.bf16.gmra.mrb[4].mxu1 %vm204_vm0, %v1374_v44  ;;  %v1094_v44 = vld [vmem:[#allocation11] ss:$0 sm:$0xff] }
 0x198   :  { %1272 = vmatpush3.bf16.msra.mxu1 %v1356_v12 }
 0x199   :  { %1273 = vmatprep.subr.bf16.mxu1 %v1357_v13 }
 0x19c   :  { %1274 = vmatpush3.bf16.msra.mxu1 %v1357_v13 }
 0x262   :  { %v1245_v49 = vpop.f32.mrb[0].mxu1 }
 0x263   :  { %v375_v51 = vpop.f32.mrb[1].mxu1  ;;  %v384_v53 = vadd.f32 %v1245_v49, %v1076_v50 }
 0x264   :  { %v1246_v52 = vpop.f32.mrb[2].mxu1  ;;  %v376_v56 = vadd.f32 %v1076_v50, %v375_v51 }
 0x265   :  { %v387_v54 = vadd.f32 %v1246_v52, %v1076_v50  ;;  %v378_v55 = vpop.f32.mrb[3].mxu1 }
 0x266   :  { %v379_v57 = vadd.f32 %v1076_v50, %v378_v55 }
 0x267   :  { %v407_v58 = vpack.c.bf16 %v387_v54, %v384_v53 }
 0x268   :  { %v406_v59 = vpack.c.bf16 %v379_v57, %v376_v56 }
 0x26a   :  { %1375 = vtanh.bf16 %v406_v59  ;;  %v1249_v60 = vpop.f32.mrb[4].mxu1 }
 0x26b   :  { %1377 = vtanh.bf16 %v407_v58  ;;  %v391_v61 = vpop.f32.mrb[5].mxu1  ;;  %v400_v63 = vadd.f32 %v1249_v60, %v1076_v50 }
 0x26c   :  { %v1250_v62 = vpop.f32.mrb[6].mxu1  ;;  %v392_v2 = vadd.f32 %v1076_v50, %v391_v61 }
 0x26d   :  { %v403_v0 = vadd.f32 %v1250_v62, %v1076_v50  ;;  %v394_v1 = vpop.f32.mrb[7].mxu1 }
 0x26e   :  { %v395_v3 = vadd.f32 %v1076_v50, %v394_v1 }
 0x26f   :  { %v409_v4 = vpack.c.bf16 %v403_v0, %v400_v63 }
 0x270   :  { %v408_v5 = vpack.c.bf16 %v395_v3, %v392_v2 }
 0x272   :  { %1379 = vtanh.bf16 %v408_v5  ;;  %v1363_v5 = vld [vmem:[%s1921_s11 + $0x8] sm:$0xff]  }
 0x273   :  { %1381 = vtanh.bf16 %v409_v4  ;;  %v1362_v4 = vld [vmem:[%s1921_s11] sm:$0xff]  }
 0x274   :  { %1299 = vmatprep.subr.bf16.mxu1 %v1362_v4 }
 0x275   :  { %v1376_v6 = vpop.eup %1375 }
 0x276   :  { %v1378_v7 = vpop.eup %1377  ;;  %1259 = vmatprep.mubr.msk.bf16.mxu0 %vm204_vm0, %v1376_v6  ;;  %v1364_v6 = vld [vmem:[%s1921_s11 + $0x10] sm:$0xff]  }
 0x277   :  { %1260 = vmatmul.mubr.msk.bf16.vlgmr.msra.gmra.mrb[8].mxu0 %vm204_vm0, %v1378_v7  ;;  %v1365_v7 = vld [vmem:[%s1921_s11 + $0x18] sm:$0xff]  }
 0x278   :  { %1284 = vmatpush3.bf16.msra.mxu0 %v1358_v39 }
 0x279   :  { %1285 = vmatprep.subr.bf16.mxu0 %v1359_v40 }
 0x27c   :  { %1286 = vmatpush3.bf16.msra.mxu0 %v1359_v40 }
 0x27d   :  { %v1380_v8 = vpop.eup %1379  ;;  %1287 = vmatprep.subr.bf16.mxu0 %v1360_v41 }
 0x27e   :  { %v1382_v9 = vpop.eup %1381  ;;  %1263 = vmatprep.mubr.msk.bf16.mxu0 %vm204_vm0, %v1380_v8 }
 0x27f   :  { %1264 = vmatmul.mubr.msk.bf16.gmra.mrb[12].mxu0 %vm204_vm0, %v1382_v9  ;;  %v1103_v9 = vld [vmem:[#allocation14] ss:$0 sm:$0xff] }
 0x280   :  { %1288 = vmatpush3.bf16.msra.mxu0 %v1360_v41 }
 0x281   :  { %1289 = vmatprep.subr.bf16.mxu0 %v1361_v42 }
 0x284   :  { %1290 = vmatpush3.bf16.msra.mxu0 %v1361_v42 }
 0x34a   :  { %v1261_v14 = vpop.f32.mrb[8].mxu0 }
 0x34b   :  { %v499_v16 = vpop.f32.mrb[9].mxu0  ;;  %v508_v18 = vadd.f32 %v1261_v14, %v1085_v15 }
 0x34c   :  { %v1262_v17 = vpop.f32.mrb[10].mxu0  ;;  %v500_v21 = vadd.f32 %v1085_v15, %v499_v16 }
 0x34d   :  { %v511_v19 = vadd.f32 %v1262_v17, %v1085_v15  ;;  %v502_v20 = vpop.f32.mrb[11].mxu0 }
 0x34e   :  { %v503_v22 = vadd.f32 %v1085_v15, %v502_v20 }
 0x34f   :  { %v531_v23 = vpack.c.bf16 %v511_v19, %v508_v18 }
 0x350   :  { %v530_v24 = vpack.c.bf16 %v503_v22, %v500_v21 }
 0x352   :  { %1383 = vtanh.bf16 %v530_v24  ;;  %v1265_v25 = vpop.f32.mrb[12].mxu0 }
 0x353   :  { %1385 = vtanh.bf16 %v531_v23  ;;  %v515_v26 = vpop.f32.mrb[13].mxu0  ;;  %v524_v28 = vadd.f32 %v1265_v25, %v1085_v15 }
 0x354   :  { %v1266_v27 = vpop.f32.mrb[14].mxu0  ;;  %v516_v31 = vadd.f32 %v1085_v15, %v515_v26 }
 0x355   :  { %v527_v29 = vadd.f32 %v1266_v27, %v1085_v15  ;;  %v518_v30 = vpop.f32.mrb[15].mxu0 }
 0x356   :  { %v519_v32 = vadd.f32 %v1085_v15, %v518_v30 }
 0x357   :  { %v533_v33 = vpack.c.bf16 %v527_v29, %v524_v28 }
 0x358   :  { %v532_v34 = vpack.c.bf16 %v519_v32, %v516_v31 }
 0x35a   :  { %1387 = vtanh.bf16 %v532_v34 }
 0x35b   :  { %1389 = vtanh.bf16 %v533_v33  ;;  %v1366_v33 = vld [vmem:[%s1923_s13] sm:$0x1f]  }
 0x35c   :  { %1327 = vmatprep.subr.msk.bf16.mxu0 %vm937_vm1, %v1366_v33  ;;  %v939_v34 = vsel %vm937_vm1, %v1366_v33, 0 }
 0x35d   :  { %v1384_v35 = vpop.eup %1383 }
 0x35e   :  { %v1386_v36 = vpop.eup %1385  ;;  %1275 = vmatprep.mubr.msk.bf16.mxu1 %vm204_vm0, %v1384_v35 }
 0x35f   :  { %1276 = vmatmul.mubr.msk.bf16.vlgmr.msra.gmra.mrb[8].mxu1 %vm204_vm0, %v1386_v36  ;;  %v1112_v36 = vld [vmem:[%s1922_s12] ss:$0 sm:$0xff] }
 0x360   :  { %1300 = vmatpush3.bf16.msra.mxu1 %v1362_v4 }
 0x361   :  { %1301 = vmatprep.subr.bf16.mxu1 %v1363_v5 }
 0x364   :  { %1302 = vmatpush3.bf16.msra.mxu1 %v1363_v5 }
 0x365   :  { %v1388_v37 = vpop.eup %1387  ;;  %1303 = vmatprep.subr.bf16.mxu1 %v1364_v6 }
 0x366   :  { %v1390_v38 = vpop.eup %1389  ;;  %1279 = vmatprep.mubr.msk.bf16.mxu1 %vm204_vm0, %v1388_v37 }
 0x367   :  { %1280 = vmatmul.mubr.msk.bf16.gmra.mrb[12].mxu1 %vm204_vm0, %v1390_v38 }
 0x368   :  { %1304 = vmatpush3.bf16.msra.mxu1 %v1364_v6 }
 0x369   :  { %1305 = vmatprep.subr.bf16.mxu1 %v1365_v7 }
 0x36c   :  { %1306 = vmatpush3.bf16.msra.mxu1 %v1365_v7 }
 0x36d   :  { %1328 = vmatprep.subr.msk.bf16.mxu1 %vm937_vm1, %v1366_v33 }
 0x432   :  { %v1277_v43 = vpop.f32.mrb[8].mxu1 }
 0x433   :  { %v623_v45 = vpop.f32.mrb[9].mxu1  ;;  %v632_v47 = vadd.f32 %v1277_v43, %v1094_v44 }
 0x434   :  { %v1278_v46 = vpop.f32.mrb[10].mxu1  ;;  %v624_v50 = vadd.f32 %v1094_v44, %v623_v45 }
 0x435   :  { %v635_v48 = vadd.f32 %v1278_v46, %v1094_v44  ;;  %v626_v49 = vpop.f32.mrb[11].mxu1 }
 0x436   :  { %v627_v51 = vadd.f32 %v1094_v44, %v626_v49 }
 0x437   :  { %v655_v52 = vpack.c.bf16 %v635_v48, %v632_v47 }
 0x438   :  { %v654_v53 = vpack.c.bf16 %v627_v51, %v624_v50 }
 0x43a   :  { %1391 = vtanh.bf16 %v654_v53  ;;  %v1281_v54 = vpop.f32.mrb[12].mxu1 }
 0x43b   :  { %1393 = vtanh.bf16 %v655_v52  ;;  %v639_v55 = vpop.f32.mrb[13].mxu1  ;;  %v648_v57 = vadd.f32 %v1281_v54, %v1094_v44 }
 0x43c   :  { %v1282_v56 = vpop.f32.mrb[14].mxu1  ;;  %v640_v60 = vadd.f32 %v1094_v44, %v639_v55 }
 0x43d   :  { %v651_v58 = vadd.f32 %v1282_v56, %v1094_v44  ;;  %v642_v59 = vpop.f32.mrb[15].mxu1 }
 0x43e   :  { %v643_v61 = vadd.f32 %v1094_v44, %v642_v59 }
 0x43f   :  { %v657_v62 = vpack.c.bf16 %v651_v58, %v648_v57 }
 0x440   :  { %v656_v63 = vpack.c.bf16 %v643_v61, %v640_v60  ;;  %v1121_v61 = vld [vmem:[%s1924_s14] ss:$0 sm:$0xff]  ;;  %s1591_s14 = scalar_lea.vmem %s1052_s0, 512 }
 0x441   :  { %p1592_p8 = scmp.ne.s32.totalorder %s1052_s0, %s1591_s14  ;;  %p1597_p10 = scmp.lt.s32.totalorder %s1591_s14, %s1591_s14 }
 0x442   :  { %1395 = vtanh.bf16 %v656_v63 }
 0x443   :  { %1397 = vtanh.bf16 %v657_v62  ;;  %p1598_p11 = por %p1597_p10, %p1596_p9 }
 0x445   :  { %v1392_v0 = vpop.eup %1391  ;;  %p1599_p12 = pnand %p1598_p11, %p1592_p8 }
 0x446   :  { %v1394_v1 = vpop.eup %1393  ;;  %1291 = vmatprep.mubr.msk.bf16.mxu0 %vm204_vm0, %v1392_v0 }
 0x447   :  { %1292 = vmatmul.mubr.msk.bf16.vlgmr.msra.gmra.mrb[16].mxu0 %vm204_vm0, %v1394_v1 }
 0x448   :  { %1316 = vmatpush3.bf16.msra.mxu0 %v939_v34 }
 0x44d   :  { %v1396_v2 = vpop.eup %1395 }
 0x44e   :  { %v1398_v3 = vpop.eup %1397  ;;  %1295 = vmatprep.mubr.msk.bf16.mxu0 %vm204_vm0, %v1396_v2 }
 0x44f   :  { %1296 = vmatmul.mubr.msk.bf16.gmra.mrb[20].mxu0 %vm204_vm0, %v1398_v3 }
 0x51a   :  { %v1293_v8 = vpop.f32.mrb[16].mxu0 }
 0x51b   :  { %v747_v10 = vpop.f32.mrb[17].mxu0  ;;  %v756_v12 = vadd.f32 %v1293_v8, %v1103_v9 }
 0x51c   :  { %v1294_v11 = vpop.f32.mrb[18].mxu0  ;;  %v748_v15 = vadd.f32 %v1103_v9, %v747_v10 }
 0x51d   :  { %v759_v13 = vadd.f32 %v1294_v11, %v1103_v9  ;;  %v750_v14 = vpop.f32.mrb[19].mxu0 }
 0x51e   :  { %v751_v16 = vadd.f32 %v1103_v9, %v750_v14 }
 0x51f   :  { %v779_v17 = vpack.c.bf16 %v759_v13, %v756_v12 }
 0x520   :  { %v778_v18 = vpack.c.bf16 %v751_v16, %v748_v15 }
 0x522   :  { %1399 = vtanh.bf16 %v778_v18  ;;  %v1297_v19 = vpop.f32.mrb[20].mxu0 }
 0x523   :  { %1401 = vtanh.bf16 %v779_v17  ;;  %v763_v20 = vpop.f32.mrb[21].mxu0  ;;  %v772_v22 = vadd.f32 %v1297_v19, %v1103_v9 }
 0x524   :  { %v1298_v21 = vpop.f32.mrb[22].mxu0  ;;  %v764_v25 = vadd.f32 %v1103_v9, %v763_v20 }
 0x525   :  { %v775_v23 = vadd.f32 %v1298_v21, %v1103_v9  ;;  %v766_v24 = vpop.f32.mrb[23].mxu0 }
 0x526   :  { %v767_v26 = vadd.f32 %v1103_v9, %v766_v24 }
 0x527   :  { %v781_v27 = vpack.c.bf16 %v775_v23, %v772_v22 }
 0x528   :  { %v780_v28 = vpack.c.bf16 %v767_v26, %v764_v25 }
 0x52a   :  { %1403 = vtanh.bf16 %v780_v28 }
 0x52b   :  { %1405 = vtanh.bf16 %v781_v27 }
 0x52d   :  { %v1400_v29 = vpop.eup %1399 }
 0x52e   :  { %v1402_v30 = vpop.eup %1401  ;;  %1307 = vmatprep.mubr.msk.bf16.mxu1 %vm204_vm0, %v1400_v29 }
 0x52f   :  { %1308 = vmatmul.mubr.msk.bf16.vlgmr.msra.gmra.mrb[16].mxu1 %vm204_vm0, %v1402_v30 }
 0x530   :  { %1326 = vmatpush3.bf16.msra.mxu1 %v939_v34 }
 0x535   :  { %v1404_v31 = vpop.eup %1403 }
 0x536   :  { %v1406_v32 = vpop.eup %1405  ;;  %1311 = vmatprep.mubr.msk.bf16.mxu1 %vm204_vm0, %v1404_v31 }
 0x537   :  { %1312 = vmatmul.mubr.msk.bf16.gmra.mrb[20].mxu1 %vm204_vm0, %v1406_v32 }
 0x602   :  { %v1309_v35 = vpop.f32.mrb[16].mxu1 }
 0x603   :  { %v871_v37 = vpop.f32.mrb[17].mxu1  ;;  %v880_v39 = vadd.f32 %v1309_v35, %v1112_v36 }
 0x604   :  { %v1310_v38 = vpop.f32.mrb[18].mxu1  ;;  %v872_v42 = vadd.f32 %v1112_v36, %v871_v37 }
 0x605   :  { %v883_v40 = vadd.f32 %v1310_v38, %v1112_v36  ;;  %v874_v41 = vpop.f32.mrb[19].mxu1 }
 0x606   :  { %v875_v43 = vadd.f32 %v1112_v36, %v874_v41 }
 0x607   :  { %v903_v44 = vpack.c.bf16 %v883_v40, %v880_v39 }
 0x608   :  { %v902_v45 = vpack.c.bf16 %v875_v43, %v872_v42 }
 0x60a   :  { %1407 = vtanh.bf16 %v902_v45  ;;  %v1313_v46 = vpop.f32.mrb[20].mxu1 }
 0x60b   :  { %1409 = vtanh.bf16 %v903_v44  ;;  %v887_v47 = vpop.f32.mrb[21].mxu1  ;;  %v896_v49 = vadd.f32 %v1313_v46, %v1112_v36 }
 0x60c   :  { %v1314_v48 = vpop.f32.mrb[22].mxu1  ;;  %v888_v52 = vadd.f32 %v1112_v36, %v887_v47 }
 0x60d   :  { %v899_v50 = vadd.f32 %v1314_v48, %v1112_v36  ;;  %v890_v51 = vpop.f32.mrb[23].mxu1 }
 0x60e   :  { %v891_v53 = vadd.f32 %v1112_v36, %v890_v51 }
 0x60f   :  { %v905_v54 = vpack.c.bf16 %v899_v50, %v896_v49 }
 0x610   :  { %v904_v55 = vpack.c.bf16 %v891_v53, %v888_v52 }
 0x612   :  { %1411 = vtanh.bf16 %v904_v55 }
 0x613   :  { %1413 = vtanh.bf16 %v905_v54 }
 0x615   :  { %v1408_v56 = vpop.eup %1407 }
 0x616   :  { %v1410_v57 = vpop.eup %1409  ;;  %1317 = vmatprep.mubr.msk.bf16.mxu0 %vm924_vm2, %v1408_v56 }
 0x617   :  { %1318 = vmatmul.mubr.msk.bf16.vlgmr.msra.gmra.mrb[24].mxu0 %vm924_vm2, %v1410_v57 }
 0x61d   :  { %v1412_v58 = vpop.eup %1411 }
 0x61e   :  { %v1414_v59 = vpop.eup %1413  ;;  %1321 = vmatprep.mubr.msk.bf16.mxu1 %vm924_vm2, %v1412_v58 }
 0x61f   :  { %1322 = vmatmul.mubr.msk.bf16.vlgmr.msra.gmra.mrb[24].mxu1 %vm924_vm2, %v1414_v59 }
 0x6ea   :  { %v1319_v60 = vpop.f32.mrb[24].mxu0 }
 0x6eb   :  { %v975_v62 = vpop.f32.mrb[25].mxu0  ;;  %v984_v0 = vadd.f32 %v1319_v60, %v1121_v61 }
 0x6ec   :  { %v1320_v63 = vpop.f32.mrb[26].mxu0  ;;  %v976_v3 = vadd.f32 %v1121_v61, %v975_v62 }
 0x6ed   :  { %v987_v1 = vadd.f32 %v1320_v63, %v1121_v61  ;;  %v978_v2 = vpop.f32.mrb[27].mxu0 }
 0x6ee   :  { %v979_v4 = vadd.f32 %v1121_v61, %v978_v2 }
 0x6ef   :  { %v1151_v5 = vpack.c.bf16 %v987_v1, %v984_v0 }
 0x6f0   :  { %v1146_v6 = vpack.c.bf16 %v979_v4, %v976_v3 }
 0x6f1   :  { %1163 = vst [vmem:[#allocation16 + $0x8] sm:$0xff] %v1151_v5  }
 0x6f2   :  { %1147 = vst [vmem:[#allocation16] sm:$0xff] %v1146_v6   ;;  %v1323_v7 = vpop.f32.mrb[24].mxu1 }
 0x6f3   :  { %v991_v8 = vpop.f32.mrb[25].mxu1  ;;  %v1000_v10 = vadd.f32 %v1323_v7, %v1121_v61 }
 0x6f4   :  { %v1324_v9 = vpop.f32.mrb[26].mxu1  ;;  %v992_v13 = vadd.f32 %v1121_v61, %v991_v8 }
 0x6f5   :  { %v1003_v11 = vadd.f32 %v1324_v9, %v1121_v61  ;;  %v994_v12 = vpop.f32.mrb[27].mxu1 }
 0x6f6   :  { %v995_v14 = vadd.f32 %v1121_v61, %v994_v12 }
 0x6f7   :  { %v1161_v15 = vpack.c.bf16 %v1003_v11, %v1000_v10 }
 0x6f8   :  { %v1156_v16 = vpack.c.bf16 %v995_v14, %v992_v13 }
 0x6f9   :  { %1165 = vst [vmem:[#allocation16 + $0x18] sm:$0xff] %v1161_v15  }
 0x6fa   :  { %1164 = vst [vmem:[#allocation16 + $0x10] sm:$0xff] %v1156_v16  }
 0x6fb   :  { %1602 = shalt.err (!%p1599_p12)
}
 0x6fc   :  { %s1928_s1 = sld [smem:[#allocation23_spill]] }
 0x702   :  { %s1603_s6 = scalar_lea.hbm %s1928_s1, 512 }
 0x703   :  { %p1604_p13 = scmp.ne.s32.totalorder %s1928_s1, %s1603_s6  ;;  %p1607_p0 = scmp.lt.u32.totalorder %s1603_s6, %s1928_s1 }
 0x705   :  { %p1609_p1 = pnand %p1607_p0, %p1604_p13 }
 0x707   :  { %1612 = shalt.err (!%p1609_p1)
}
 0x708   :  { %1057 = dma.vmem_to_hbm [thread:$0]  %s1052_s0, 512, %s1928_s1, [#allocation4], %s1626_s28, %s1626_s28, %s1627_s29  }
 0x709   :  { %1623 = dma.done.wait [#allocation4], 512  }
 0x70a   :  { %1624 = vsyncadd [#allocation4], 4294966784 }
 0x70b   :  { %1061 = vsyncpa [#allocation3], 1 }
 0x70c   :  { %1062 = vsyncpa [#allocation6], 1 }
 0x70d   :  { %1063 = vsyncpa [#allocation9], 1 }
 0x70e   :  { %1064 = vsyncpa [#allocation12], 1 }
 0x70f   :  { %1065 = vsyncpa [#allocation15], 1 }
 0x710   :  { %1066 = vsyncpa [#allocation4], 1 }

</bundles_post_ra>
